<compile_context>
chip_gen: v5e
topology: v5e:2x2
jax: 0.10.0
libtpu: 0.0.40
codegen_flags: <defaults>
</compile_context>

<pallas_src>
import functools

import jax
import jax.numpy as jnp
from jax.experimental import pallas as pl
from jax.experimental.pallas import tpu as pltpu


def hashing_kernel(x_ref, w_ref, b_ref, p_ref, out_ref, *, num_table, code_length):
    """One batch tile of the Hashing forward.

    x_ref:   (bm, H)        activations (f32 or bf16)
    w_ref:   (H, T*L)       projection weight, bit-major column order
    b_ref:   (1, T*L)  f32  projection bias, bit-major order
    p_ref:   (T*L, T) bf16  constant powers-of-two matrix: P[l*T + t, t] = 2**l
    out_ref: (bm, 2*T) f32  lanes [0,T)  = code (exact integer value, cast in wrapper)
                            lanes [T,2T) = score (product of |z| per table)
    """
    T, L = num_table, code_length
    TD = T * L

    x = x_ref[...]
    if x.dtype != w_ref.dtype:
        # In-kernel cast: the tile already sits in VMEM, so this is VPU work
        # hidden under the next tile's DMA instead of a separate XLA HBM pass.
        x = x.astype(w_ref.dtype)

    # Dense projection on the MXU; accumulate in f32.  Epilogue stays f32
    # (v5e's VPU has no bf16 path, and the accumulator is already f32).
    z = jnp.dot(x, w_ref[...], preferred_element_type=jnp.float32) + b_ref[...]

    # Hash code: sign bits weighted by 2**l, folded through a tiny constant
    # MXU matmul.  bits in {0,1} and 2**l are exact in bf16, accumulation is
    # f32 -> exact integers for code_length <= 24 (asserted in the wrapper).
    bits = (z > 0.0).astype(p_ref.dtype)
    code_f = jnp.dot(bits, p_ref[...], preferred_element_type=jnp.float32)

    # Score: product over bits of |z|.  Bit-major layout [bit0|tables, bit1|
    # tables, ...] lets a log2(L) halving tree combine bit l with bit l+L/2 of
    # the same table with a single elementwise multiply per level.
    a = jnp.abs(z)
    if L & (L - 1) == 0:                       # power-of-two code_length
        width = TD
        while width > T:
            width //= 2
            a = a[:, :width] * a[:, width:2 * width]
        score = a
    else:
        # TODO(synk): non-power-of-two code_length falls back to the unrolled
        #             lane-slice product (correct, just more masked VPU work).
        score = a[:, 0:T]
        for l in range(1, L):
            score = score * a[:, l * T:(l + 1) * T]
    # TODO(synk): for very large code_length / |z|, switch score to
    #             exp(sum(log|z|)) (MXU+EUP) to avoid f32 overflow/underflow.

    # Single lane-packed output tile (one output DMA stream instead of two
    # lane-sparse (bm, T) outputs).
    out_ref[:, 0:T] = code_f
    out_ref[:, T:2 * T] = score


def prepare_hashing_params(weight, bias, *, num_table, code_length,
                           compute_dtype=jnp.bfloat16):
    """One-time parameter prep. Call at init time, NOT per forward.

    weight: (T*L, H) as stored by nn.Linear; bias: (T*L,).
    Returns (wt, bp, pmat):
      wt   (H, T*L)  transposed weight, columns permuted to bit-major order
                     (new col l*T + t  <-  old col t*L + l), cast to compute_dtype
      bp   (1, T*L)  permuted bias (f32: it is added post-matmul)
      pmat (T*L, T)  constant code-weight matrix with 2**l at row l*T + t (bf16)
    """
    T, L = num_table, code_length
    TD = T * L
    assert weight.shape[0] == TD and bias.shape == (TD,)

    j = jnp.arange(TD)
    perm = (j % T) * L + (j // T)
    wt = weight.T[:, perm].astype(compute_dtype)            # (H, TD)
    bp = bias[perm].astype(jnp.float32).reshape(1, TD)      # (1, TD)

    rows = jnp.arange(TD)
    cols = jnp.arange(T)
    pmat = jnp.where((rows[:, None] % T) == cols[None, :],
                     jnp.exp2((rows // T).astype(jnp.float32))[:, None],
                     0.0).astype(jnp.bfloat16)               # (TD, T), exact
    return wt, bp, pmat


def _physical_vmem_bytes():
    """Per-core VMEM capacity; conservative 64 MiB fallback (v7x size)."""
    try:
        info = pltpu.get_tpu_info()
        for name in ("vmem_capacity_bytes", "vmem_size_bytes", "vmem_bytes"):
            v = getattr(info, name, None)
            if v:
                return int(v)
    except Exception:
        pass
    return 64 * 1024 * 1024


def hashing_forward(x, wt, bp, pmat, *, num_table, code_length, block_b=None):
    """Pallas forward. x: (B, H); wt/bp/pmat from prepare_hashing_params."""
    B, H = x.shape
    T, L = num_table, code_length
    TD = T * L
    assert wt.shape == (H, TD) and bp.shape == (1, TD) and pmat.shape == (TD, T)
    # TODO(synk): for code_length > 24 switch the code epilogue to an int32
    #             accumulation loop (f32 sum of 2**l is only exact up to 24 bits).
    assert L <= 24, "code accumulation is exact in f32 only for code_length <= 24"

    x_item = jnp.dtype(x.dtype).itemsize
    w_item = jnp.dtype(wt.dtype).itemsize

    # --- per-chip VMEM plan (v5e/v6e: 128 MiB physical, v7x: 64 MiB) ---------
    phys = _physical_vmem_bytes()
    vmem_budget = int(min((phys * 3) // 4, 100 * 1024 * 1024))  # 96 MiB / 48 MiB

    if block_b is None:
        # grid-invariant operands (wt single-buffered via pl.Buffered(1)) + slack.
        # TODO(synk): if H*TD itself outgrows the budget, the TD/H dims need tiling.
        fixed = H * TD * w_item + TD * 4 + TD * T * 2 + (4 << 20)
        # per-batch-row bytes: double-buffered x tile, in-kernel compute copy of x,
        # f32 intermediates (z, |z|, bits, code/score), double-buffered packed out.
        per_row = 2 * H * x_item + H * w_item + 4 * TD * 4 + 2 * (2 * T) * 4
        rows = max(8, (vmem_budget - fixed) // per_row)
        # ~8 MiB of x per grid step is plenty to sit at HBM roofline.
        rows = min(rows, max(8, (8 * 1024 * 1024) // max(1, H * x_item)))
        # >= 4 grid steps for large batches: >= 2 steps per TensorCore on v7x
        # (megacore) and DMA/compute overlap within each core.
        if B >= 64:
            rows = min(rows, pl.cdiv(B, 4))
        block_b = int(rows)

    # Sublane-legal tile; never larger than the (8-rounded-down) batch.
    if B <= 8:
        block_b = B                      # block == full dim is always legal
    else:
        block_b = max(8, (min(block_b, B) // 8) * 8)

    # No jnp.pad: Pallas handles the ragged final block; its tail rows are
    # never stored (out-of-bounds writes are discarded) and nothing below
    # depends on their values.
    grid = (pl.cdiv(B, block_b),)

    invariant = pl.Buffered(1)           # wt/bp/pmat never change across the grid
    kernel = functools.partial(hashing_kernel, num_table=T, code_length=L)
    packed = pl.pallas_call(
        kernel,
        out_shape=jax.ShapeDtypeStruct((B, 2 * T), jnp.float32),
        grid_spec=pltpu.PrefetchScalarGridSpec(
            num_scalar_prefetch=0,
            grid=grid,
            in_specs=[
                pl.BlockSpec((block_b, H), lambda i: (i, 0)),
                pl.BlockSpec((H, TD), lambda i: (0, 0), pipeline_mode=invariant),
                pl.BlockSpec((1, TD), lambda i: (0, 0), pipeline_mode=invariant),
                pl.BlockSpec((TD, T), lambda i: (0, 0), pipeline_mode=invariant),
            ],
            out_specs=pl.BlockSpec((block_b, 2 * T), lambda i: (i, 0)),
        ),
        compiler_params=pltpu.CompilerParams(
            dimension_semantics=("parallel",),
            vmem_limit_bytes=vmem_budget),
    )(x, wt, bp, pmat)

    code = packed[:, :T].astype(jnp.int32)
    score = packed[:, T:]
    return code, score


def hashing_reference(x, weight, bias, *, num_table, code_length):
    """Pure-JAX reference mirroring the assumed PyTorch forward."""
    B = x.shape[0]
    z = jnp.dot(x.astype(jnp.float32), weight.T.astype(jnp.float32),
                precision=jax.lax.Precision.HIGHEST) + bias
    z3 = z.reshape(B, num_table, code_length)
    bits = (z3 > 0).astype(jnp.int32)
    code = jnp.sum(bits * (2 ** jnp.arange(code_length, dtype=jnp.int32)), axis=-1)
    score = jnp.prod(jnp.abs(z3), axis=-1)
    return code, score, jnp.abs(z3)      # |z| mirrors the module's last_z_abs


if __name__ == "__main__":
    # Small config consistent with the module: hidden_size=32, 4 tables x 8-bit codes.
    hidden_size = 32
    num_table = 4
    code_length = 8
    total_dim = num_table * code_length

    key = jax.random.PRNGKey(0)
    kx, kw, kb, kx2 = jax.random.split(key, 4)

    # Deterministic nn.Linear-style init: U(-1/sqrt(H), 1/sqrt(H)).
    bound = 1.0 / (hidden_size ** 0.5)
    weight = jax.random.uniform(kw, (total_dim, hidden_size), jnp.float32, -bound, bound)
    bias = jax.random.uniform(kb, (total_dim,), jnp.float32, -bound, bound)

    wt32, bp32, pmat = prepare_hashing_params(
        weight, bias, num_table=num_table, code_length=code_length,
        compute_dtype=jnp.float32)

    def check_against_reference(x):
        code, score = hashing_forward(x, wt32, bp32, pmat,
                                      num_table=num_table, code_length=code_length)
        jax.block_until_ready((code, score))
        code_ref, score_ref, z_abs = hashing_reference(
            x, weight, bias, num_table=num_table, code_length=code_length)
        assert code.shape == code_ref.shape and code.dtype == jnp.int32
        assert score.shape == score_ref.shape and score.dtype == jnp.float32
        # Hash bits are ill-conditioned where z ~ 0; require exact code match only
        # for tables whose smallest |z| sits clearly above numerical noise.
        stable = jnp.min(z_abs, axis=-1) > 1e-4
        assert bool(jnp.all(jnp.where(stable, code == code_ref, True)))
        assert bool(jnp.allclose(score, score_ref, rtol=1e-4, atol=1e-6))

    # --- f32 path, block-aligned batch: verified against the pure-JAX reference.
    x8 = jax.random.normal(kx, (8, hidden_size), dtype=jnp.float32)
    check_against_reference(x8)

    # --- f32 path, ragged batch (B % block_b != 0): exercises the pad-free tail block.
    x13 = jax.random.normal(kx2, (13, hidden_size), dtype=jnp.float32)
    check_against_reference(x13)

    # --- bf16-weight fast path: x stays f32 in HBM (no wrapper-side cast pass);
    # the tile is cast to bf16 inside the kernel after it lands in VMEM.  Sign
    # decisions for near-zero z can legitimately differ from the f32 reference,
    # so only shape/dtype are checked here.
    wt16, bp16, pmat16 = prepare_hashing_params(
        weight, bias, num_table=num_table, code_length=code_length,
        compute_dtype=jnp.bfloat16)
    code16, score16 = hashing_forward(x8, wt16, bp16, pmat16,
                                      num_table=num_table, code_length=code_length)
    jax.block_until_ready((code16, score16))
    assert code16.shape == (8, num_table) and score16.shape == (8, num_table)
    assert code16.dtype == jnp.int32 and score16.dtype == jnp.float32

    print("KERNEL_OK")
</pallas_src>

<mosaic_0001>
module attributes {stable_mosaic.version = 11 : i64} {
  func.func @hashing_kernel(%arg0: i32, %arg1: memref<8x32xf32, #tpu.memory_space<vmem>>, %arg2: memref<32x32xf32, #tpu.memory_space<vmem>>, %arg3: memref<1x32xf32, #tpu.memory_space<vmem>>, %arg4: memref<32x4xbf16, #tpu.memory_space<vmem>>, %arg5: memref<8x8xf32, #tpu.memory_space<vmem>>) attributes {dimension_semantics = [#tpu.dimension_semantics<parallel>], iteration_bounds = array<i64: 1>, scalar_prefetch = 0 : i64, scratch_operands = 0 : i64, tpu.core_type = #tpu.core_type<tc>, window_params = [{transform_indices = @transform_0, window_bounds = array<i64: 8, 32>}, {pipeline_mode = #tpu.pipeline_mode<synchronous>, transform_indices = @transform_1, window_bounds = array<i64: 32, 32>}, {pipeline_mode = #tpu.pipeline_mode<synchronous>, transform_indices = @transform_2, window_bounds = array<i64: 1, 32>}, {pipeline_mode = #tpu.pipeline_mode<synchronous>, transform_indices = @transform_3, window_bounds = array<i64: 32, 4>}, {transform_indices = @transform_4, window_bounds = array<i64: 8, 8>}]} {
    %c0 = arith.constant 0 : index
    %c0_0 = arith.constant 0 : index
    %0 = vector.load %arg1[%c0, %c0_0] : memref<8x32xf32, #tpu.memory_space<vmem>>, vector<8x32xf32>
    %c0_1 = arith.constant 0 : index
    %c0_2 = arith.constant 0 : index
    %1 = vector.load %arg2[%c0_1, %c0_2] : memref<32x32xf32, #tpu.memory_space<vmem>>, vector<32x32xf32>
    %cst = arith.constant dense<0.000000e+00> : vector<8x32xf32>
    %2 = tpu.matmul %0, %1, %cst {dimension_numbers = #tpu.dot_dimension_numbers<[1], [0], [0], [1], [0, 0, 1, 1], [], []>} : vector<8x32xf32>, vector<32x32xf32>, vector<8x32xf32> -> vector<8x32xf32>
    %c0_3 = arith.constant 0 : index
    %c0_4 = arith.constant 0 : index
    %3 = vector.load %arg3[%c0_3, %c0_4] : memref<1x32xf32, #tpu.memory_space<vmem>>, vector<1x32xf32>
    %4 = vector.broadcast %3 : vector<1x32xf32> to vector<8x32xf32>
    %5 = arith.addf %2, %4 : vector<8x32xf32>
    %cst_5 = arith.constant 0.000000e+00 : f32
    %6 = vector.broadcast %cst_5 : f32 to vector<8x32xf32>
    %7 = arith.cmpf ogt, %5, %6 : vector<8x32xf32>
    %8 = arith.extui %7 : vector<8x32xi1> to vector<8x32xi32>
    %9 = arith.sitofp %8 : vector<8x32xi32> to vector<8x32xf32>
    %10 = arith.truncf %9 : vector<8x32xf32> to vector<8x32xbf16>
    %c0_6 = arith.constant 0 : index
    %c0_7 = arith.constant 0 : index
    %11 = vector.load %arg4[%c0_6, %c0_7] : memref<32x4xbf16, #tpu.memory_space<vmem>>, vector<32x4xbf16>
    %cst_8 = arith.constant dense<0.000000e+00> : vector<8x4xf32>
    %12 = tpu.matmul %10, %11, %cst_8 {dimension_numbers = #tpu.dot_dimension_numbers<[1], [0], [0], [1], [0, 0, 1, 1], [], []>} : vector<8x32xbf16>, vector<32x4xbf16>, vector<8x4xf32> -> vector<8x4xf32>
    %13 = math.absf %5 : vector<8x32xf32>
    %14 = vector.extract_strided_slice %13 {offsets = [0, 0], sizes = [8, 16], strides = [1, 1]} : vector<8x32xf32> to vector<8x16xf32>
    %15 = vector.extract_strided_slice %13 {offsets = [0, 16], sizes = [8, 16], strides = [1, 1]} : vector<8x32xf32> to vector<8x16xf32>
    %16 = arith.mulf %14, %15 : vector<8x16xf32>
    %17 = vector.extract_strided_slice %16 {offsets = [0, 0], sizes = [8, 8], strides = [1, 1]} : vector<8x16xf32> to vector<8x8xf32>
    %18 = vector.extract_strided_slice %16 {offsets = [0, 8], sizes = [8, 8], strides = [1, 1]} : vector<8x16xf32> to vector<8x8xf32>
    %19 = arith.mulf %17, %18 : vector<8x8xf32>
    %20 = vector.extract_strided_slice %19 {offsets = [0, 0], sizes = [8, 4], strides = [1, 1]} : vector<8x8xf32> to vector<8x4xf32>
    %21 = vector.extract_strided_slice %19 {offsets = [0, 4], sizes = [8, 4], strides = [1, 1]} : vector<8x8xf32> to vector<8x4xf32>
    %22 = arith.mulf %20, %21 : vector<8x4xf32>
    %c0_9 = arith.constant 0 : index
    %c0_10 = arith.constant 0 : index
    %23 = vector.load %arg5[%c0_9, %c0_10] : memref<8x8xf32, #tpu.memory_space<vmem>>, vector<8x4xf32>
    tpu.vector_store %arg5[%c0_9, %c0_10], %12 {strides = array<i32>} : memref<8x8xf32, #tpu.memory_space<vmem>>, vector<8x4xf32>,
    %c0_11 = arith.constant 0 : index
    %c4 = arith.constant 4 : index
    %24 = vector.load %arg5[%c0_11, %c4] : memref<8x8xf32, #tpu.memory_space<vmem>>, vector<8x4xf32>
    tpu.vector_store %arg5[%c0_11, %c4], %22 {strides = array<i32>} : memref<8x8xf32, #tpu.memory_space<vmem>>, vector<8x4xf32>,
    return
  }
  func.func @transform_0(%arg0: i32) -> (i32, i32) {
    %c0_i32 = arith.constant 0 : i32
    %c0_i32_0 = arith.constant 0 : i32
    return %arg0, %c0_i32 : i32, i32
  }
  func.func @transform_1(%arg0: i32) -> (i32, i32) {
    %c0_i32 = arith.constant 0 : i32
    %c0_i32_0 = arith.constant 0 : i32
    %c0_i32_1 = arith.constant 0 : i32
    return %c0_i32, %c0_i32_0 : i32, i32
  }
  func.func @transform_2(%arg0: i32) -> (i32, i32) {
    %c0_i32 = arith.constant 0 : i32
    %c0_i32_0 = arith.constant 0 : i32
    %c0_i32_1 = arith.constant 0 : i32
    return %c0_i32, %c0_i32_0 : i32, i32
  }
  func.func @transform_3(%arg0: i32) -> (i32, i32) {
    %c0_i32 = arith.constant 0 : i32
    %c0_i32_0 = arith.constant 0 : i32
    %c0_i32_1 = arith.constant 0 : i32
    return %c0_i32, %c0_i32_0 : i32, i32
  }
  func.func @transform_4(%arg0: i32) -> (i32, i32) {
    %c0_i32 = arith.constant 0 : i32
    %c0_i32_0 = arith.constant 0 : i32
    return %arg0, %c0_i32 : i32, i32
  }
}

</mosaic_0001>

<bundles_post_ra>
// kernel: tpu_custom_call.1
= control target key start
LH: loop header
LB: loop body
LE: loop exit
PB: predicated region body
PF: predicated region fallthrough
CT: control target
= control target key end

     0   :  { %9 = vsyncpa [#allocation3], 0  ;;  %s274_s0 = inlined_call_operand.vmem [shape: f32[8,32], index: 0, kind: input, shape index: {}]   ;;  %s275_s1 = inlined_call_operand.hbm [shape: f32[32,32], index: 1, kind: input, shape index: {}]   ;;  %s276_s2 = inlined_call_operand.vmem [shape: f32[1,32], index: 2, kind: input, shape index: {}]   ;;  %s277_s3 = inlined_call_operand.vmem [shape: bf16[32,4], index: 3, kind: input, shape index: {}]   ;;  %s278_s4 = inlined_call_operand.hbm [shape: f32[8,8], index: 4, kind: output, shape index: {}]  }
   0x1   :  { %10 = vsyncpa [#allocation4], 0  ;;  %s17_s17 = sshll.u32 %s275_s1, 4  ;;  %s220_s18 = smov [#allocation2]   ;;  %s18_s17 = int_to_ptr.hbm [resolvable:$true] %s17_s17 }
   0x2   :  { %s19_s19 = sshll.u32 %s220_s18, 4  ;;  %s221_s20 = smov 128   ;;  %s20_s19 = int_to_ptr.vmem [resolvable:$true] %s19_s19 }
   0x3   :  { %s222_s21 = smov 8  }
   0x4   :  { %25 = dma.hbm_to_vmem [thread:$0]  %s18_s17, 512, %s20_s19, [#allocation3], %s221_s20, %s221_s20, %s222_s21  }
   0x5   :  { %216 = dma.done.wait [#allocation3], 512  }
   0x6   :  { %217 = vsyncadd [#allocation3], 4294966784  ;;  %v39_v0 = vld [vmem:[#allocation2 + $0x18] sm:$0xff]  ;;  %v38_v1 = vld [vmem:[#allocation2 + $0x10] sm:$0xff]  ;;  %vm44_vm0 = vcmask 261120   ;;  %v223_v11 = vmov 0.0  }
   0x7   :  { %60 = vmatpush.msra.mxu0 %v39_v0  ;;  %v37_v2 = vld [vmem:[#allocation2 + $0x8] sm:$0xff]  ;;  %v36_v3 = vld [vmem:[#allocation2] sm:$0xff]  ;;  %s225_s29 = smov 120   ;;  %vm120_vm2 = vcmask 31744   ;;  %s228_s30 = smov [#allocation5]   ;;  %vm126_vm3 = vcmask 64544  }
   0x8   :  { %v35_v4 = vld [vmem:[%s274_s0] sm:$0xff]  ;;  %v157_v5 = vld [vmem:[%s277_s3 + $0x8] sm:$0xff]  ;;  %s224_s0 = smov 112   ;;  %s133_s5 = sshll.u32 %s228_s30, 4  ;;  %s134_s5 = int_to_ptr.vmem [resolvable:$true] %s133_s5 }
   0x9   :  { %61 = vmatpush.msra.mxu0 %v38_v1  ;;  %97 = vmatpush.bf16.msra.mxu1 %v157_v5  ;;  %v156_v6 = vld [vmem:[%s277_s3] sm:$0xff]  ;;  %s227_s3 = smov 4   ;;  %s135_s8 = sshll.u32 %s278_s4, 4  ;;  %s136_s8 = int_to_ptr.hbm [resolvable:$true] %s135_s8 }
   0xa   :  { %v167_v7 = vld [vmem:[%s276_s2] ss:$0 sm:$0xff]  ;;  %s226_s2 = smov 124  }
   0xb   :  { %62 = vmatpush.msra.mxu0 %v37_v2 }
   0xd   :  { %63 = vmatpush.msra.mxu0 %v36_v3  ;;  %98 = vmatpush.bf16.msra.mxu1 %v156_v6 }
   0xe   :  { %145 = vmatmul.msk.f32.vlgmr.msra.gmra.mxu0 %vm44_vm0, %v35_v4 }
  0x8b   :  { %v65_v8 = vpop.f32.mrf.mxu0 }
  0x8c   :  { %v66_v9 = vadd.f32 %v167_v7, %v65_v8 }
  0x8e   :  { %vm68_vm1 = vcmp.gt.f32.partialorder %v66_v9, 0.0  ;;  %v104_v10 = vand.u32 2147483647, %v66_v9 }
  0x8f   :  { %v146_v12 = vsel %vm68_vm1, 1.0, %v223_v11 }
  0x90   :  { %v71_v13 = vpack.c.bf16 %v146_v12, %v146_v12  ;;  %106 = vrot.lane.b32.xlu0 %v104_v10, %s224_s0 }
  0x92   :  { %155 = vmatmul.msk.bf16.vlgmr.msra.gmra.mxu1 %vm44_vm0, %v71_v13 }
 0x102   :  { %v107_v14 = vpop.permute.xlu0 %106 }
 0x103   :  { %v109_v15 = vmul.f32 %v107_v14, %v104_v10 }
 0x105   :  { %111 = vrot.lane.b32.xlu0 %v109_v15, %s225_s29 }
 0x10f   :  { %v100_v16 = vpop.f32.mrf.mxu1 }
 0x110   :  { %121 = vst.msk [vmem:[#allocation5] sm:$0xff] %vm120_vm2, %v100_v16 }
 0x117   :  { %v102_v17 = vpop.f32.mrf.mxu1 }
 0x177   :  { %v112_v18 = vpop.permute.xlu0 %111 }
 0x178   :  { %v114_v19 = vmul.f32 %v112_v18, %v109_v15 }
 0x17a   :  { %116 = vrot.lane.b32.xlu1 %v114_v19, %s226_s2 }
 0x1ec   :  { %v117_v20 = vpop.permute.xlu1 %116 }
 0x1ed   :  { %v119_v21 = vmul.f32 %v117_v20, %v114_v19 }
 0x1ef   :  { %123 = vrot.lane.b32.xlu1 %v119_v21, %s227_s3 }
 0x261   :  { %v124_v22 = vpop.permute.xlu1 %123 }
 0x262   :  { %127 = vst.msk [vmem:[#allocation5] sm:$0xff] %vm126_vm3, %v124_v22 }
 0x263   :  { %138 = dma.vmem_to_hbm [thread:$0]  %s134_s5, 128, %s136_s8, [#allocation4]  }
 0x264   :  { %218 = dma.done.wait [#allocation4], 128  }
 0x265   :  { %219 = vsyncadd [#allocation4], 4294967168 }
 0x266   :  { %143 = vsyncpa [#allocation3], 1 }
 0x267   :  { %144 = vsyncpa [#allocation4], 1 }

</bundles_post_ra>
